<compile_context>
chip_gen: v5e
topology: v5e:2x2
jax: 0.10.0
libtpu: 0.0.40
codegen_flags: <defaults>
</compile_context>

<pallas_src>
import jax
import jax.numpy as jnp
from jax.experimental import pallas as pl
from jax.experimental.pallas import tpu as pltpu

_DEFAULT_BLOCK_BYTES = 4 * 1024 * 1024   # v5e / v6e sweet spot (16 MiB dbl-buffered)
_V7X_BLOCK_BYTES = 8 * 1024 * 1024       # v7x: 3.2 TB/s HBM -> bigger blocks pay off
_MAX_WIDTH = 8192                        # widest lane-dense slab we search for


def _sublane_multiple(dtype):
    itemsize = jnp.dtype(dtype).itemsize
    return {4: 8, 2: 16, 1: 32}.get(itemsize, 8)


def _target_block_bytes():
    """Generation-aware block sizing (best effort; safe fallback to 4 MiB)."""
    get_info = getattr(pltpu, "get_tpu_info", None)
    if get_info is not None:
        try:
            info = get_info()
            name = " ".join(
                str(getattr(info, attr, ""))
                for attr in ("chip_version", "version", "chip_name", "name")
            ).lower()
            if "7" in name:          # v7x-class chip
                return _V7X_BLOCK_BYTES
        except Exception:
            pass
    return _DEFAULT_BLOCK_BYTES


def _choose_width(n, sublane):
    """Widest width (multiple of 128) dividing n; prefer widths that also make
    rows = n // width a multiple of the sublane count (fully dense vregs)."""
    hi = min(_MAX_WIDTH, (n // 128) * 128)
    if hi < 128:
        return None
    # Pass 1: lane-dense AND sublane-dense.
    for w in range(hi, 127, -128):
        if n % w == 0 and (n // w) % sublane == 0:
            return w
    # Pass 2: lane-dense only.
    for w in range(hi, 127, -128):
        if n % w == 0:
            return w
    return None


def _adaptive_tanh_kernel(coeff_ref, x_ref, o_ref):
    # coeff_ref: (1,) f32 scalar in SMEM (scalar-prefetched: param * scale_factor).
    # x_ref / o_ref: (block_rows, width) VMEM tiles.
    coeff = coeff_ref[0]
    x = x_ref[...].astype(jnp.float32)             # VPU mul + EUP tanh in f32
    o_ref[...] = jnp.tanh(coeff * x).astype(o_ref.dtype)


def _run_2d(x2d, coeff, out_dtype, block_bytes):
    """Run the elementwise kernel over a lane-dense 2-D slab."""
    rows, width = x2d.shape
    sublane = _sublane_multiple(x2d.dtype)
    itemsize = max(jnp.dtype(x2d.dtype).itemsize, jnp.dtype(out_dtype).itemsize)

    # Balanced, sublane-aligned block rows targeting ~block_bytes per buffer.
    target_rows = max(sublane,
                      (block_bytes // (width * itemsize)) // sublane * sublane)
    if rows <= target_rows or rows <= sublane:
        block_rows = rows                       # full-extent block: always legal
    else:
        nblocks = pl.cdiv(rows, target_rows)
        block_rows = pl.cdiv(pl.cdiv(rows, nblocks), sublane) * sublane
    grid = (pl.cdiv(rows, block_rows),)

    # 2x input + 2x output double-buffers + headroom; capped below v7x's
    # 64 MiB physical VMEM per TensorCore.
    block_actual = block_rows * width * itemsize
    vmem_limit = int(min(max(4 * block_actual + (8 << 20), 32 << 20), 48 << 20))

    return pl.pallas_call(
        _adaptive_tanh_kernel,
        out_shape=jax.ShapeDtypeStruct((rows, width), out_dtype),
        grid_spec=pltpu.PrefetchScalarGridSpec(
            num_scalar_prefetch=1,              # coeff staged once into SMEM
            grid=grid,
            in_specs=[pl.BlockSpec((block_rows, width), lambda i, c: (i, 0))],
            out_specs=pl.BlockSpec((block_rows, width), lambda i, c: (i, 0)),
        ),
        compiler_params=pltpu.CompilerParams(
            dimension_semantics=("parallel",),  # lets v7x shard blocks over 2 TCs
            vmem_limit_bytes=vmem_limit,
        ),
    )(coeff, x2d)


def adaptive_tanh(x, param, scale_factor=1.0):
    """tanh(param * x * scale_factor), elementwise, via a Pallas TPU kernel."""
    orig_shape = x.shape
    n = x.size
    # Match PyTorch promotion: f32 parameter * x promotes half/bf16 results to f32.
    out_dtype = jnp.promote_types(x.dtype, jnp.float32)
    coeff = (jnp.asarray(param, dtype=jnp.float32)
             * jnp.float32(scale_factor)).reshape(1)

    if n == 0:
        return jnp.zeros(orig_shape, out_dtype)

    block_bytes = _target_block_bytes()
    sublane = _sublane_multiple(x.dtype)

    width = _choose_width(n, sublane)
    if width is not None:
        # Common case: zero-copy reshape to a dense (rows, width) slab.
        y2d = _run_2d(x.reshape(n // width, width), coeff, out_dtype, block_bytes)
        return y2d.reshape(orig_shape)

    # Ragged fallback (size has no multiple-of-128 divisor): kernel on the
    # 128-aligned prefix, tiny (<128 elem) tail in plain JAX.  Avoids the old
    # full-array pad + output-slice HBM round trips.
    flat = x.reshape(-1)
    m = (n // 128) * 128
    parts = []
    if m:
        w = _choose_width(m, sublane)
        prefix = flat[:m].reshape(m // w, w)
        parts.append(_run_2d(prefix, coeff, out_dtype, block_bytes).reshape(-1))
    if m < n:
        tail = flat[m:].astype(jnp.float32)
        parts.append(jnp.tanh(coeff[0] * tail).astype(out_dtype))
    y = parts[0] if len(parts) == 1 else jnp.concatenate(parts)
    return y.reshape(orig_shape)


if __name__ == "__main__":
    key = jax.random.PRNGKey(0)

    # Small NCHW input consistent with a conv-style activation module.
    x = jax.random.normal(key, (2, 4, 16, 16), dtype=jnp.float32)
    param = jnp.float32(1.0)
    scale_factor = 1.0

    y = jax.block_until_ready(adaptive_tanh(x, param, scale_factor))
    y_ref = jnp.tanh(param * x * scale_factor)
    assert y.shape == x.shape and y.dtype == x.dtype
    assert jnp.allclose(y, y_ref, atol=1e-6, rtol=1e-6)

    # Ragged-size sanity check (exercises the aligned-prefix + tail fallback).
    x2 = jax.random.normal(jax.random.PRNGKey(1), (3, 5, 7, 11), dtype=jnp.float32)
    y2 = jax.block_until_ready(adaptive_tanh(x2, jnp.float32(0.75), 2.0))
    y2_ref = jnp.tanh(jnp.float32(0.75) * x2 * 2.0)
    assert y2.shape == x2.shape
    assert jnp.allclose(y2, y2_ref, atol=1e-6, rtol=1e-6)

    print("KERNEL_OK")
</pallas_src>

<mosaic_0001>
module attributes {stable_mosaic.version = 11 : i64} {
  func.func @_adaptive_tanh_kernel(%arg0: i32, %arg1: memref<1xf32, #tpu.memory_space<smem>>, %arg2: memref<8x256xf32, #tpu.memory_space<vmem>>, %arg3: memref<8x256xf32, #tpu.memory_space<vmem>>) attributes {dimension_semantics = [#tpu.dimension_semantics<parallel>], iteration_bounds = array<i64: 1>, scalar_prefetch = 1 : i64, scratch_operands = 0 : i64, tpu.core_type = #tpu.core_type<tc>, window_params = [{transform_indices = @transform_0, window_bounds = array<i64: 8, 256>}, {transform_indices = @transform_1, window_bounds = array<i64: 8, 256>}]} {
    %c0 = arith.constant 0 : index
    %0 = memref.load %arg1[%c0] : memref<1xf32, #tpu.memory_space<smem>>
    %c0_0 = arith.constant 0 : index
    %c0_1 = arith.constant 0 : index
    %1 = vector.load %arg2[%c0_0, %c0_1] : memref<8x256xf32, #tpu.memory_space<vmem>>, vector<8x256xf32>
    %2 = vector.broadcast %0 : f32 to vector<8x256xf32>
    %3 = arith.mulf %2, %1 : vector<8x256xf32>
    %4 = math.tanh %3 : vector<8x256xf32>
    %c0_2 = arith.constant 0 : index
    %c0_3 = arith.constant 0 : index
    %5 = vector.load %arg3[%c0_2, %c0_3] : memref<8x256xf32, #tpu.memory_space<vmem>>, vector<8x256xf32>
    tpu.vector_store %arg3[%c0_2, %c0_3], %4 {strides = array<i32>} : memref<8x256xf32, #tpu.memory_space<vmem>>, vector<8x256xf32>,
    return
  }
  func.func @transform_0(%arg0: i32, %arg1: memref<1xf32, #tpu.memory_space<smem>>) -> (i32, i32) {
    %c0_i32 = arith.constant 0 : i32
    %c0_i32_0 = arith.constant 0 : i32
    return %arg0, %c0_i32 : i32, i32
  }
  func.func @transform_1(%arg0: i32, %arg1: memref<1xf32, #tpu.memory_space<smem>>) -> (i32, i32) {
    %c0_i32 = arith.constant 0 : i32
    %c0_i32_0 = arith.constant 0 : i32
    return %arg0, %c0_i32 : i32, i32
  }
}

</mosaic_0001>

<bundles_post_ra>
// kernel: tpu_custom_call.1
= control target key start
LH: loop header
LB: loop body
LE: loop exit
PB: predicated region body
PF: predicated region fallthrough
CT: control target
= control target key end

     0   :  { %8 = vsyncpa [#allocation5], 0  ;;  %s136_s0 = inlined_call_operand.<no memory space> [shape: f32[1], index: 0, kind: input, shape index: {}]   ;;  %s137_s1 = inlined_call_operand.hbm [shape: f32[8,256], index: 1, kind: input, shape index: {}]   ;;  %s138_s2 = inlined_call_operand.hbm [shape: f32[8,256], index: 2, kind: output, shape index: {}]  }
   0x1   :  { %9 = vsyncpa [#allocation6], 0  ;;  %s15_s11 = sshll.u32 %s137_s1, 4  ;;  %s110_s12 = smov [#allocation4]   ;;  %s16_s11 = int_to_ptr.hbm [resolvable:$true] %s15_s11 }
   0x2   :  { %s17_s13 = sshll.u32 %s110_s12, 4  ;;  %s18_s13 = int_to_ptr.vmem [resolvable:$true] %s17_s13 }
   0x3   :  { %20 = dma.hbm_to_vmem [thread:$0]  %s16_s11, 256, %s18_s13, [#allocation5]  }
   0x4   :  { %106 = dma.done.wait [#allocation5], 256  }
   0x5   :  { %107 = vsyncadd [#allocation5], 4294967040  ;;  %v28_v0 = vstv %s136_s0  ;;  %v26_v1 = vld [vmem:[#allocation4] sm:$0xff]  ;;  %v27_v2 = vld [vmem:[#allocation4 + $0x8] sm:$0xff]  ;;  %s111_s16 = smov [#allocation7]   ;;  %s42_s19 = sshll.u32 %s138_s2, 4  ;;  %s43_s19 = int_to_ptr.hbm [resolvable:$true] %s42_s19 }
   0x6   :  { %v29_v3 = vmul.f32 %v28_v0, %v26_v1  ;;  %v30_v4 = vmul.f32 %v28_v0, %v27_v2  ;;  %s40_s17 = sshll.u32 %s111_s16, 4  ;;  %s41_s17 = int_to_ptr.vmem [resolvable:$true] %s40_s17 }
   0x8   :  { %54 = vtanh.f32 %v29_v3 }
   0x9   :  { %56 = vtanh.f32 %v30_v4 }
   0xe   :  { %v55_v5 = vpop.eup %54 }
   0xf   :  { %v57_v6 = vpop.eup %56  ;;  %33 = vst [vmem:[#allocation7] sm:$0xff] %v55_v5 }
  0x10   :  { %34 = vst [vmem:[#allocation7 + $0x8] sm:$0xff] %v57_v6 }
  0x11   :  { %45 = dma.vmem_to_hbm [thread:$0]  %s41_s17, 256, %s43_s19, [#allocation6]  }
  0x12   :  { %108 = dma.done.wait [#allocation6], 256  }
  0x13   :  { %109 = vsyncadd [#allocation6], 4294967040 }
  0x14   :  { %50 = vsyncpa [#allocation5], 1 }
  0x15   :  { %51 = vsyncpa [#allocation6], 1 }

</bundles_post_ra>
